<compile_context>
chip_gen: v6e
topology: v6e:2x2x1
jax: 0.10.0
libtpu: 0.0.40
codegen_flags: <defaults>
</compile_context>

<pallas_src>
import functools
import math

import jax
import jax.numpy as jnp
from jax import lax
from jax.experimental import pallas as pl
from jax.experimental.pallas import tpu as pltpu

P_DROP = 0.1                       # nn.Dropout(p=0.1)
_TARGET_TILE_BYTES = 2 * 1024 * 1024   # ~2 MiB per input tile buffer

# Hardware PRNG on real TPUs; software counter hash elsewhere (interpret/CPU).
_USE_HW_PRNG = jax.default_backend() == "tpu"


def _dreammap_train_kernel(seed_ref, x_ref, o_ref, *, p, use_hw_prng):
    """o = tanh(inverted_dropout(x)); dropout mask from 32 random bits/elem."""
    if use_hw_prng:
        # Re-seed per grid step so iterations are independent/stateless
        # (required for "parallel" dimension_semantics / dual-TC sharding).
        pltpu.prng_seed(seed_ref[0], pl.program_id(0))
        bits = pltpu.prng_random_bits(x_ref.shape).astype(jnp.uint32)
    else:
        # Fallback: lowbias32-style avalanche hash of the GLOBAL flat element
        # index (tiling-invariant), keyed by the user seed.  Pure jnp uint32.
        bd, h, w = x_ref.shape
        d_idx = lax.broadcasted_iota(jnp.uint32, (bd, h, w), 0)
        h_idx = lax.broadcasted_iota(jnp.uint32, (bd, h, w), 1)
        w_idx = lax.broadcasted_iota(jnp.uint32, (bd, h, w), 2)
        depth0 = pl.program_id(0).astype(jnp.uint32) * jnp.uint32(bd)
        gidx = (depth0 + d_idx) * jnp.uint32(h * w) + h_idx * jnp.uint32(w) + w_idx
        hsh = gidx ^ (seed_ref[0].astype(jnp.uint32) * jnp.uint32(0x9E3779B9))
        hsh = hsh ^ (hsh >> 16)
        hsh = hsh * jnp.uint32(0x7FEB352D)
        hsh = hsh ^ (hsh >> 15)
        hsh = hsh * jnp.uint32(0x846CA68B)
        hsh = hsh ^ (hsh >> 16)
        bits = hsh

    # Keep with prob (1 - p): uniform uint32 below round(p * 2^32) is dropped.
    thr = jnp.uint32(int(round(p * float(1 << 32))))
    keep = bits >= thr
    scale = jnp.float32(1.0 / (1.0 - p))

    x = x_ref[...].astype(jnp.float32)
    y = jnp.tanh(jnp.where(keep, x * scale, jnp.float32(0.0)))   # tanh -> EUP
    o_ref[...] = y.astype(o_ref.dtype)


def dream_map_forward(map_param, seed=0, *, training=True, p=P_DROP,
                      block_depth=None):
    """Forward pass of DreamMap: tanh(dropout(map)). Returns same shape/dtype."""
    orig_shape = map_param.shape
    orig_dtype = map_param.dtype

    if not training or p == 0.0:
        # Dropout is identity in eval mode; plain tanh is already one fused
        # HBM-roofline XLA elementwise op — no Pallas call needed.
        return jnp.tanh(map_param.astype(jnp.float32)).astype(orig_dtype)

    # View as (D, H, W): collapse leading dims, keep last two dims whole so
    # block_shape's last two dims == full array dims (no (8,128) constraint)
    # and no padding / slice-back copies are needed.  Reshape is free
    # (contiguous).
    if map_param.ndim >= 3:
        H, W = orig_shape[-2], orig_shape[-1]
        D = math.prod(orig_shape[:-2])
    elif map_param.ndim == 2:
        (H, W), D = orig_shape, 1
    else:  # 0-D / 1-D parameter (not used by DreamMap, kept for generality)
        D, H, W = 1, 1, max(1, math.prod(orig_shape))
    x3d = map_param.reshape(D, H, W)

    itemsize = jnp.dtype(orig_dtype).itemsize
    slice_bytes = max(1, H * W * itemsize)
    if block_depth is None:
        block_depth = max(1, min(D, _TARGET_TILE_BYTES // slice_bytes))
    block_depth = max(1, min(D, int(block_depth)))
    grid = (pl.cdiv(D, block_depth),)   # partial final block is handled by Pallas

    out3d = pl.pallas_call(
        functools.partial(_dreammap_train_kernel, p=p, use_hw_prng=_USE_HW_PRNG),
        out_shape=jax.ShapeDtypeStruct((D, H, W), orig_dtype),
        grid_spec=pltpu.PrefetchScalarGridSpec(
            num_scalar_prefetch=1,
            grid=grid,
            in_specs=[pl.BlockSpec((block_depth, H, W), lambda i, s: (i, 0, 0))],
            out_specs=pl.BlockSpec((block_depth, H, W), lambda i, s: (i, 0, 0)),
        ),
        compiler_params=pltpu.CompilerParams(
            # Per-step reseed makes iterations independent -> safe to shard the
            # grid across both TensorCores on v7x (neutral on v5e/v6e).
            dimension_semantics=("parallel",),
        ),
    )(jnp.array([seed], dtype=jnp.int32), x3d)

    return out3d.reshape(orig_shape)


if __name__ == "__main__":
    # Deterministic init mimicking torch.rand(...) * 2 - 1 -> uniform(-1, 1).
    # Small, deliberately NOT lane-aligned stand-in for the real
    # (1, 1, 31, 255, 255) map (same rank, same full-extent last-two-dim path).
    key = jax.random.PRNGKey(0)
    shape = (1, 1, 7, 31, 31)
    map_param = jax.random.uniform(key, shape, dtype=jnp.float32) * 2.0 - 1.0

    out = jax.block_until_ready(dream_map_forward(map_param, seed=0, training=True))

    # Sanity: shape/dtype preserved, finite, tanh bounds, ~p fraction zeroed,
    # kept elements equal tanh(x / (1 - p)).
    assert out.shape == map_param.shape and out.dtype == map_param.dtype
    assert bool(jnp.all(jnp.isfinite(out))) and bool(jnp.all(jnp.abs(out) <= 1.0))
    drop_frac = float(jnp.mean((out == 0.0).astype(jnp.float32)))
    assert 0.03 < drop_frac < 0.20, f"unexpected dropout fraction {drop_frac}"
    ref = jnp.tanh(map_param / (1.0 - P_DROP))
    kept = out != 0.0
    assert bool(jnp.allclose(jnp.where(kept, out, ref), ref, atol=5e-3))

    # Exercise the multi-step grid with a ragged final block (the real
    # (1,1,31,255,255) map tiles as 4 depth-8 blocks with a depth-7 tail).
    shape2 = (1, 1, 31, 33, 65)
    map2 = jax.random.uniform(jax.random.PRNGKey(1), shape2, jnp.float32) * 2.0 - 1.0
    out2 = jax.block_until_ready(
        dream_map_forward(map2, seed=3, training=True, block_depth=8))
    assert out2.shape == shape2 and out2.dtype == map2.dtype
    assert bool(jnp.all(jnp.isfinite(out2))) and bool(jnp.all(jnp.abs(out2) <= 1.0))
    drop_frac2 = float(jnp.mean((out2 == 0.0).astype(jnp.float32)))
    assert 0.03 < drop_frac2 < 0.20, f"unexpected dropout fraction {drop_frac2}"
    ref2 = jnp.tanh(map2 / (1.0 - P_DROP))
    kept2 = out2 != 0.0
    assert bool(jnp.allclose(jnp.where(kept2, out2, ref2), ref2, atol=5e-3))

    # Eval path: dropout is identity.
    out_eval = jax.block_until_ready(dream_map_forward(map_param, training=False))
    assert bool(jnp.allclose(out_eval, jnp.tanh(map_param), atol=1e-6))

    print("KERNEL_OK")
</pallas_src>

<mosaic_0001>
module attributes {stable_mosaic.version = 11 : i64} {
  func.func @_dreammap_train_kernel(%arg0: i32, %arg1: memref<1xi32, #tpu.memory_space<smem>>, %arg2: memref<7x31x31xf32, #tpu.memory_space<vmem>>, %arg3: memref<7x31x31xf32, #tpu.memory_space<vmem>>) attributes {dimension_semantics = [#tpu.dimension_semantics<parallel>], iteration_bounds = array<i64: 1>, scalar_prefetch = 1 : i64, scratch_operands = 0 : i64, tpu.core_type = #tpu.core_type<tc>, window_params = [{transform_indices = @transform_0, window_bounds = array<i64: 7, 31, 31>}, {transform_indices = @transform_1, window_bounds = array<i64: 7, 31, 31>}]} {
    %0 = tpu.iota {dimensions = array<i32: 0>} : vector<7x31x31xi32>
    %1 = tpu.iota {dimensions = array<i32: 1>} : vector<7x31x31xi32>
    %2 = tpu.iota {dimensions = array<i32: 2>} : vector<7x31x31xi32>
    %c7_i32 = arith.constant 7 : i32
    %3 = arith.muli %arg0, %c7_i32 : i32
    %4 = vector.broadcast %3 : i32 to vector<7x31x31xi32>
    %5 = arith.addi %4, %0 : vector<7x31x31xi32>
    %c961_i32 = arith.constant 961 : i32
    %6 = vector.broadcast %c961_i32 : i32 to vector<7x31x31xi32>
    %7 = arith.muli %5, %6 : vector<7x31x31xi32>
    %c31_i32 = arith.constant 31 : i32
    %8 = vector.broadcast %c31_i32 : i32 to vector<7x31x31xi32>
    %9 = arith.muli %1, %8 : vector<7x31x31xi32>
    %10 = arith.addi %7, %9 : vector<7x31x31xi32>
    %11 = arith.addi %10, %2 : vector<7x31x31xi32>
    %c0 = arith.constant 0 : index
    %12 = memref.load %arg1[%c0] : memref<1xi32, #tpu.memory_space<smem>>
    %c-1640531527_i32 = arith.constant -1640531527 : i32
    %13 = arith.muli %12, %c-1640531527_i32 : i32
    %14 = vector.broadcast %13 : i32 to vector<7x31x31xi32>
    %15 = arith.xori %11, %14 : vector<7x31x31xi32>
    %c16_i32 = arith.constant 16 : i32
    %16 = vector.broadcast %c16_i32 : i32 to vector<7x31x31xi32>
    %17 = arith.shrui %15, %16 : vector<7x31x31xi32>
    %18 = arith.xori %15, %17 : vector<7x31x31xi32>
    %c2146121005_i32 = arith.constant 2146121005 : i32
    %19 = vector.broadcast %c2146121005_i32 : i32 to vector<7x31x31xi32>
    %20 = arith.muli %18, %19 : vector<7x31x31xi32>
    %c15_i32 = arith.constant 15 : i32
    %21 = vector.broadcast %c15_i32 : i32 to vector<7x31x31xi32>
    %22 = arith.shrui %20, %21 : vector<7x31x31xi32>
    %23 = arith.xori %20, %22 : vector<7x31x31xi32>
    %c-2073254261_i32 = arith.constant -2073254261 : i32
    %24 = vector.broadcast %c-2073254261_i32 : i32 to vector<7x31x31xi32>
    %25 = arith.muli %23, %24 : vector<7x31x31xi32>
    %c16_i32_0 = arith.constant 16 : i32
    %26 = vector.broadcast %c16_i32_0 : i32 to vector<7x31x31xi32>
    %27 = arith.shrui %25, %26 : vector<7x31x31xi32>
    %28 = arith.xori %25, %27 : vector<7x31x31xi32>
    %c429496730_i32 = arith.constant 429496730 : i32
    %29 = vector.broadcast %c429496730_i32 : i32 to vector<7x31x31xi32>
    %30 = arith.cmpi uge, %28, %29 : vector<7x31x31xi32>
    %c0_1 = arith.constant 0 : index
    %c0_2 = arith.constant 0 : index
    %c0_3 = arith.constant 0 : index
    %31 = vector.load %arg2[%c0_1, %c0_2, %c0_3] : memref<7x31x31xf32, #tpu.memory_space<vmem>>, vector<7x31x31xf32>
    %cst = arith.constant 1.11111116 : f32
    %32 = vector.broadcast %cst : f32 to vector<7x31x31xf32>
    %33 = arith.mulf %31, %32 : vector<7x31x31xf32>
    %cst_4 = arith.constant 0.000000e+00 : f32
    %34 = vector.broadcast %cst_4 : f32 to vector<7x31x31xf32>
    %35 = arith.select %30, %33, %34 : vector<7x31x31xi1>, vector<7x31x31xf32>
    %36 = math.tanh %35 : vector<7x31x31xf32>
    %c0_5 = arith.constant 0 : index
    %c0_6 = arith.constant 0 : index
    %c0_7 = arith.constant 0 : index
    %37 = vector.load %arg3[%c0_5, %c0_6, %c0_7] : memref<7x31x31xf32, #tpu.memory_space<vmem>>, vector<7x31x31xf32>
    tpu.vector_store %arg3[%c0_5, %c0_6, %c0_7], %36 {strides = array<i32>} : memref<7x31x31xf32, #tpu.memory_space<vmem>>, vector<7x31x31xf32>,
    return
  }
  func.func @transform_0(%arg0: i32, %arg1: memref<1xi32, #tpu.memory_space<smem>>) -> (i32, i32, i32) {
    %c0_i32 = arith.constant 0 : i32
    %c0_i32_0 = arith.constant 0 : i32
    %c0_i32_1 = arith.constant 0 : i32
    return %arg0, %c0_i32, %c0_i32_0 : i32, i32, i32
  }
  func.func @transform_1(%arg0: i32, %arg1: memref<1xi32, #tpu.memory_space<smem>>) -> (i32, i32, i32) {
    %c0_i32 = arith.constant 0 : i32
    %c0_i32_0 = arith.constant 0 : i32
    %c0_i32_1 = arith.constant 0 : i32
    return %arg0, %c0_i32, %c0_i32_0 : i32, i32, i32
  }
}

</mosaic_0001>

<bundles_post_ra>
// kernel: tpu_custom_call.1
= control target key start
LH: loop header
LB: loop body
LE: loop exit
PB: predicated region body
PF: predicated region fallthrough
CT: control target
= control target key end

     0   :  { %8 = vsyncpa [#allocation5], 0  ;;  %s865_s0 = inlined_call_operand.<no memory space> [shape: s32[1], index: 0, kind: input, shape index: {}]   ;;  %s866_s1 = inlined_call_operand.hbm [shape: f32[7,31,31], index: 1, kind: input, shape index: {}]   ;;  %s867_s2 = inlined_call_operand.hbm [shape: f32[7,31,31], index: 2, kind: output, shape index: {}]  }
   0x1   :  { %9 = vsyncpa [#allocation6], 0  ;;  %s653_s9 = smov [#allocation4]  }
   0x2   :  { %s15_s10 = sshll.u32 %s653_s9, 4  ;;  %s16_s10 = int_to_ptr.vmem [resolvable:$true] %s15_s10 }
   0x3   :  { %s617_s11 = scalar_lea.vmem %s16_s10, 3584  ;;  %p622_p1 = scmp.lt.s32.totalorder %s16_s10, %s16_s10 }
   0x4   :  { %p618_p0 = scmp.ne.s32.totalorder %s16_s10, %s617_s11  ;;  %p623_p2 = scmp.lt.s32.totalorder %s617_s11, %s617_s11 }
   0x6   :  { %p624_p3 = por %p623_p2, %p622_p1 }
   0x8   :  { %p625_p4 = pnand %p624_p3, %p618_p0 }
   0xa   :  { %628 = shalt.err (!%p625_p4)
}
   0xb   :  { %s654_s12 = smov 128   ;;  %s655_s13 = smov 8  }
   0xc   :  { %21 = dma.hbm_to_vmem [thread:$0]  %s866_s1, 3584, %s16_s10, [#allocation5], %s654_s12, %s654_s12, %s655_s13  }
   0xd   :  { %649 = dma.done.wait [#allocation5], 3584  }
   0xe   :  { %650 = vsyncadd [#allocation5], 4294963712  ;;  %v25_v0 = vlaneseq  ;;  %s108_s18 = smul.u32 2654435769, %s865_s0  ;;  %v390_v11 = vld [vmem:[#allocation4] sm:$0xff]  ;;  %v391_v12 = vld [vmem:[#allocation4 + $0x8] sm:$0xff] }
   0xf   :  { %v392_v14 = vld [vmem:[#allocation4 + $0x10] sm:$0xff]  ;;  %v700_v18 = vmul.f32 1.1111112, %v390_v11  ;;  %v393_v20 = vld [vmem:[#allocation4 + $0x18] sm:$0x7f]  ;;  %v394_v26 = vld [vmem:[#allocation4 + $0x20] sm:$0xff] }
  0x10   :  { %v26_v1 = vshrl.u32 %v25_v0, 7  ;;  %v681_v2 = vand.u32 127, %v25_v0  ;;  %v685_v7 = vstv %s108_s18  ;;  %v707_v22 = vmul.f32 1.1111112, %v391_v12  ;;  %v395_v31 = vld [vmem:[#allocation4 + $0x28] sm:$0xff]  ;;  %s656_s0 = smov [#allocation7]  }
  0x11   :  { %v711_v24 = vmul.f32 1.1111112, %v392_v14  ;;  %v716_v29 = vmul.f32 1.1111112, %v393_v20  ;;  %v721_v34 = vmul.f32 1.1111112, %v394_v26 }
  0x12   :  { %v683_v3 = vmul.u32 31, %v26_v1  ;;  %v27_v4 = vadd.s32 8, %v26_v1  ;;  %v28_v5 = vadd.s32 16, %v26_v1  ;;  %v29_v6 = vadd.s32 24, %v26_v1  ;;  %s537_s1 = sshll.u32 %s656_s0, 4  ;;  %s538_s1 = int_to_ptr.vmem [resolvable:$true] %s537_s1 }
  0x13   :  { %v727_v43 = vmul.f32 1.1111112, %v395_v31  ;;  %vm502_vm5 = vcmask 252928   ;;  %vm506_vm7 = vcmask 251904   ;;  %s629_s19 = scalar_lea.vmem %s538_s1, 3584  ;;  %p634_p6 = scmp.lt.s32.totalorder %s538_s1, %s538_s1 }
  0x14   :  { %v79_v8 = vadd.s32 %v683_v3, %v681_v2  ;;  %v689_v9 = vmul.u32 31, %v27_v4  ;;  %v55_v10 = vadd.s32 961, %v683_v3  ;;  %v692_v13 = vmul.u32 31, %v28_v5  ;;  %p630_p5 = scmp.ne.s32.totalorder %s538_s1, %s629_s19  ;;  %p635_p7 = scmp.lt.s32.totalorder %s629_s19, %s629_s19 }
  0x15   :  { %v694_v15 = vmul.u32 31, %v29_v6  ;;  %v697_v16 = vadd.s32 1922, %v683_v3  ;;  %v705_v21 = vadd.s32 2883, %v683_v3 }
  0x16   :  { %v110_v17 = vxor.u32 %v685_v7, %v79_v8  ;;  %v80_v19 = vadd.s32 %v689_v9, %v681_v2  ;;  %v81_v23 = vadd.s32 %v692_v13, %v681_v2  ;;  %v83_v30 = vadd.s32 %v55_v10, %v681_v2  ;;  %p636_p8 = por %p635_p7, %p634_p6 }
  0x17   :  { %v82_v25 = vadd.s32 %v694_v15, %v681_v2  ;;  %v56_v35 = vadd.s32 961, %v689_v9  ;;  %v57_v39 = vadd.s32 961, %v692_v13  ;;  %v58_v51 = vadd.s32 961, %v694_v15 }
  0x18   :  { %v138_v27 = vshrl.u32 %v110_v17, 16  ;;  %v111_v28 = vxor.u32 %v685_v7, %v80_v19  ;;  %v112_v32 = vxor.u32 %v685_v7, %v81_v23  ;;  %v114_v38 = vxor.u32 %v685_v7, %v83_v30  ;;  %p637_p9 = pnand %p636_p8, %p630_p5 }
  0x19   :  { %v113_v33 = vxor.u32 %v685_v7, %v82_v25  ;;  %v84_v42 = vadd.s32 %v56_v35, %v681_v2  ;;  %v85_v47 = vadd.s32 %v57_v39, %v681_v2  ;;  %v86_v59 = vadd.s32 %v58_v51, %v681_v2  ;;  %v396_v51 = vld [vmem:[#allocation4 + $0x30] sm:$0xff] }
  0x1a   :  { %v166_v36 = vxor.u32 %v138_v27, %v110_v17  ;;  %v139_v37 = vshrl.u32 %v111_v28, 16  ;;  %v140_v40 = vshrl.u32 %v112_v32, 16  ;;  %v142_v46 = vshrl.u32 %v114_v38, 16 }
  0x1b   :  { %v141_v41 = vshrl.u32 %v113_v33, 16  ;;  %v115_v50 = vxor.u32 %v685_v7, %v84_v42  ;;  %v116_v55 = vxor.u32 %v685_v7, %v85_v47  ;;  %v117_v5 = vxor.u32 %v685_v7, %v86_v59 }
  0x1c   :  { %v194_v44 = vmul.u32 2146121005, %v166_v36  ;;  %v167_v45 = vxor.u32 %v139_v37, %v111_v28  ;;  %v168_v48 = vxor.u32 %v140_v40, %v112_v32  ;;  %v170_v54 = vxor.u32 %v142_v46, %v114_v38 }
  0x1d   :  { %v169_v49 = vxor.u32 %v141_v41, %v113_v33  ;;  %v143_v58 = vshrl.u32 %v115_v50, 16  ;;  %v144_v63 = vshrl.u32 %v116_v55, 16  ;;  %v145_v19 = vshrl.u32 %v117_v5, 16 }
  0x1e   :  { %v222_v52 = vshrl.u32 %v194_v44, 15  ;;  %v195_v53 = vmul.u32 2146121005, %v167_v45  ;;  %v196_v56 = vmul.u32 2146121005, %v168_v48 }
  0x1f   :  { %v197_v57 = vmul.u32 2146121005, %v169_v49  ;;  %v198_v62 = vmul.u32 2146121005, %v170_v54  ;;  %v171_v4 = vxor.u32 %v143_v58, %v115_v50  ;;  %v172_v11 = vxor.u32 %v144_v63, %v116_v55 }
  0x20   :  { %v250_v60 = vxor.u32 %v222_v52, %v194_v44  ;;  %v223_v61 = vshrl.u32 %v195_v53, 15  ;;  %v224_v0 = vshrl.u32 %v196_v56, 15  ;;  %v173_v31 = vxor.u32 %v145_v19, %v117_v5  ;;  %v400_v5 = vld [vmem:[#allocation4 + $0x50] sm:$0xff] }
  0x21   :  { %v225_v1 = vshrl.u32 %v197_v57, 15  ;;  %v226_v10 = vshrl.u32 %v198_v62, 15  ;;  %v199_v17 = vmul.u32 2146121005, %v171_v4  ;;  %v200_v26 = vmul.u32 2146121005, %v172_v11 }
  0x22   :  { %v278_v6 = vmul.u32 2221713035, %v250_v60  ;;  %v251_v8 = vxor.u32 %v223_v61, %v195_v53  ;;  %v252_v12 = vxor.u32 %v224_v0, %v196_v56  ;;  %v201_v40 = vmul.u32 2146121005, %v173_v31  ;;  %v398_v61 = vld [vmem:[#allocation4 + $0x40] sm:$0xff] }
  0x23   :  { %v253_v14 = vxor.u32 %v225_v1, %v197_v57  ;;  %v254_v25 = vxor.u32 %v226_v10, %v198_v62  ;;  %v227_v30 = vshrl.u32 %v199_v17, 15  ;;  %v228_v36 = vshrl.u32 %v200_v26, 15  ;;  %v399_v1 = vld [vmem:[#allocation4 + $0x48] sm:$0xff] }
  0x24   :  { %v306_v20 = vshrl.u32 %v278_v6, 16  ;;  %v279_v23 = vmul.u32 2221713035, %v251_v8  ;;  %v280_v27 = vmul.u32 2221713035, %v252_v12  ;;  %v229_v60 = vshrl.u32 %v201_v40, 15 }
  0x25   :  { %v281_v28 = vmul.u32 2221713035, %v253_v14  ;;  %v282_v35 = vmul.u32 2221713035, %v254_v25  ;;  %v255_v39 = vxor.u32 %v227_v30, %v199_v17  ;;  %v256_v44 = vxor.u32 %v228_v36, %v200_v26  ;;  %v402_v26 = vld [vmem:[#allocation4 + $0x60] sm:$0xff] }
  0x26   :  { %v334_v32 = vxor.u32 %v306_v20, %v278_v6  ;;  %v307_v33 = vshrl.u32 %v279_v23, 16  ;;  %v308_v37 = vshrl.u32 %v280_v27, 16  ;;  %v424_v59 = vmul.f32 1.1111112, %v396_v51 }
  0x27   :  { %v309_v38 = vshrl.u32 %v281_v28, 16  ;;  %v310_v42 = vshrl.u32 %v282_v35, 16  ;;  %v283_v48 = vmul.u32 2221713035, %v255_v39  ;;  %v284_v50 = vmul.u32 2221713035, %v256_v44 }
  0x28   :  { %vm362_vm0 = vcmp.ge.u32.totalorder %v334_v32, 429496730  ;;  %v335_v41 = vxor.u32 %v307_v33, %v279_v23  ;;  %v336_v46 = vxor.u32 %v308_v37, %v280_v27  ;;  %v257_v63 = vxor.u32 %v229_v60, %v201_v40 }
  0x29   :  { %v446_v45 = vsel %vm362_vm0, %v700_v18, 0.0  ;;  %v337_v47 = vxor.u32 %v309_v38, %v281_v28  ;;  %v338_v49 = vxor.u32 %v310_v42, %v282_v35  ;;  %v311_v53 = vshrl.u32 %v283_v48, 16  ;;  %v397_v18 = vld [vmem:[#allocation4 + $0x38] sm:$0x7f] }
  0x2a   :  { %553 = vtanh.f32 %v446_v45  ;;  %vm363_vm1 = vcmp.ge.u32.totalorder %v335_v41, 429496730  ;;  %vm364_vm2 = vcmp.ge.u32.totalorder %v336_v46, 429496730  ;;  %v312_v58 = vshrl.u32 %v284_v50, 16 }
  0x2b   :  { %v447_v52 = vsel %vm363_vm1, %v707_v22, 0.0  ;;  %vm365_vm3 = vcmp.ge.u32.totalorder %v337_v47, 429496730  ;;  %v448_v54 = vsel %vm364_vm2, %v711_v24, 0.0  ;;  %vm366_vm4 = vcmp.ge.u32.totalorder %v338_v49, 429496730 }
  0x2c   :  { %555 = vtanh.f32 %v447_v52  ;;  %v449_v55 = vsel %vm365_vm3, %v716_v29, 0.0  ;;  %v450_v56 = vsel %vm366_vm4, %v721_v34, 0.0  ;;  %v339_v57 = vxor.u32 %v311_v53, %v283_v48 }
  0x2d   :  { %557 = vtanh.f32 %v448_v54  ;;  %v87_v22 = vadd.s32 %v697_v16, %v681_v2  ;;  %v340_v24 = vxor.u32 %v312_v58, %v284_v50  ;;  %v425_v62 = vmul.f32 1.1111112, %v397_v18  ;;  %v403_v50 = vld [vmem:[#allocation4 + $0x68] sm:$0xff] }
  0x2e   :  { %559 = vtanh.f32 %v449_v55  ;;  %vm367_vm6 = vcmp.ge.u32.totalorder %v339_v57, 429496730  ;;  %v60_v34 = vadd.s32 1922, %v689_v9  ;;  %v745_v4 = vmul.f32 1.1111112, %v398_v61 }
  0x2f   :  { %561 = vtanh.f32 %v450_v56  ;;  %v451_v29 = vsel %vm367_vm6, %v727_v43, 0.0  ;;  %v118_v0 = vxor.u32 %v685_v7, %v87_v22  ;;  %vm368_vm8 = vcmp.ge.u32.totalorder %v340_v24, 429496730  ;;  %v401_v43 = vld [vmem:[#allocation4 + $0x58] sm:$0x7f] }
  0x30   :  { %563 = vtanh.f32 %v451_v29  ;;  %v61_v16 = vadd.s32 1922, %v692_v13  ;;  %v452_v6 = vsel %vm368_vm8, %v424_v59, 0.0  ;;  %v285_v8 = vmul.u32 2221713035, %v257_v63 }
  0x31   :  { %v146_v10 = vshrl.u32 %v118_v0, 16  ;;  %v88_v11 = vadd.s32 %v60_v34, %v681_v2  ;;  %565 = vtanh.f32 %v452_v6  ;;  %v749_v12 = vmul.f32 1.1111112, %v399_v1 }
  0x32   :  { %v89_v14 = vadd.s32 %v61_v16, %v681_v2  ;;  %v62_v17 = vadd.s32 1922, %v694_v15  ;;  %v313_v19 = vshrl.u32 %v285_v8, 16  ;;  %v754_v25 = vmul.f32 1.1111112, %v400_v5 }
  0x33   :  { %v174_v20 = vxor.u32 %v146_v10, %v118_v0  ;;  %v119_v23 = vxor.u32 %v685_v7, %v88_v11  ;;  %v758_v30 = vmul.f32 1.1111112, %v401_v43  ;;  %v91_v31 = vadd.s32 %v705_v21, %v681_v2 }
  0x34   :  { %v120_v27 = vxor.u32 %v685_v7, %v89_v14  ;;  %v90_v28 = vadd.s32 %v62_v17, %v681_v2  ;;  %v341_v32 = vxor.u32 %v313_v19, %v285_v8  ;;  %v64_v36 = vadd.s32 2883, %v689_v9 }
  0x35   :  { %v202_v33 = vmul.u32 2146121005, %v174_v20  ;;  %v147_v35 = vshrl.u32 %v119_v23, 16  ;;  %v122_v40 = vxor.u32 %v685_v7, %v91_v31  ;;  %v765_v41 = vmul.f32 1.1111112, %v402_v26 }
  0x36   :  { %v148_v38 = vshrl.u32 %v120_v27, 16  ;;  %v121_v39 = vxor.u32 %v685_v7, %v90_v28  ;;  %vm369_vm9 = vcmp.ge.u32.totalorder %v341_v32, 429496730  ;;  %v92_v21 = vadd.s32 %v64_v36, %v681_v2 }
  0x37   :  { %v554_v37 = vpop.eup %553  ;;  %v230_v42 = vshrl.u32 %v202_v33, 15  ;;  %v175_v44 = vxor.u32 %v147_v35, %v119_v23  ;;  %v453_v46 = vsel %vm369_vm9, %v425_v62, 0.0  ;;  %v150_v49 = vshrl.u32 %v122_v40, 16 }
  0x38   :  { %503 = vst.msk [vmem:[#allocation7] sm:$0xff] %vm502_vm5, %v554_v37  ;;  %v176_v47 = vxor.u32 %v148_v38, %v120_v27  ;;  %v149_v48 = vshrl.u32 %v121_v39, 16  ;;  %567 = vtanh.f32 %v453_v46  ;;  %v123_v54 = vxor.u32 %v685_v7, %v92_v21 }
  0x39   :  { %v556_v45 = vpop.eup %555  ;;  %v258_v52 = vxor.u32 %v230_v42, %v202_v33  ;;  %v203_v53 = vmul.u32 2146121005, %v175_v44  ;;  %v178_v57 = vxor.u32 %v150_v49, %v122_v40  ;;  %v65_v58 = vadd.s32 2883, %v692_v13 }
  0x3a   :  { %v558_v51 = vpop.eup %557  ;;  %504 = vst.msk [vmem:[#allocation7 + $0x8] sm:$0xff] %vm502_vm5, %v556_v45  ;;  %v204_v18 = vmul.u32 2146121005, %v176_v47  ;;  %v177_v56 = vxor.u32 %v149_v48, %v121_v39  ;;  %v151_v61 = vshrl.u32 %v123_v54, 16  ;;  %v774_v24 = vmul.f32 1.1111112, %v403_v50 }
  0x3b   :  { %v560_v55 = vpop.eup %559  ;;  %505 = vst.msk [vmem:[#allocation7 + $0x10] sm:$0xff] %vm502_vm5, %v558_v51  ;;  %v286_v60 = vmul.u32 2221713035, %v258_v52  ;;  %v231_v22 = vshrl.u32 %v203_v53, 15  ;;  %v206_v63 = vmul.u32 2146121005, %v178_v57  ;;  %v93_v0 = vadd.s32 %v65_v58, %v681_v2 }
  0x3c   :  { %v562_v59 = vpop.eup %561  ;;  %507 = vst.msk [vmem:[#allocation7 + $0x18] sm:$0x7f] %vm506_vm7, %v560_v55  ;;  %v232_v62 = vshrl.u32 %v204_v18, 15  ;;  %v205_v29 = vmul.u32 2146121005, %v177_v56  ;;  %v179_v5 = vxor.u32 %v151_v61, %v123_v54  ;;  %v66_v6 = vadd.s32 2883, %v694_v15 }
  0x3d   :  { %508 = vst.msk [vmem:[#allocation7 + $0x20] sm:$0xff] %vm502_vm5, %v562_v59  ;;  %v564_v34 = vpop.eup %563  ;;  %v314_v1 = vshrl.u32 %v286_v60, 16  ;;  %v259_v16 = vxor.u32 %v231_v22, %v203_v53  ;;  %v234_v11 = vshrl.u32 %v206_v63, 15  ;;  %v124_v43 = vxor.u32 %v685_v7, %v93_v0  ;;  %v405_v22 = vld [vmem:[#allocation4 + $0x78] sm:$0x7f] }
  0x3e   :  { %509 = vst.msk [vmem:[#allocation7 + $0x28] sm:$0xff] %vm502_vm5, %v564_v34  ;;  %v260_v8 = vxor.u32 %v232_v62, %v204_v18  ;;  %v233_v10 = vshrl.u32 %v205_v29, 15  ;;  %v566_v14 = vpop.eup %565  ;;  %v207_v20 = vmul.u32 2146121005, %v179_v5  ;;  %v94_v23 = vadd.s32 %v66_v6, %v681_v2  ;;  %v404_v18 = vld [vmem:[#allocation4 + $0x70] sm:$0xff]  ;;  %v406_v62 = vld [vmem:[#allocation4 + $0x80] sm:$0xff] }
  0x3f   :  { %v342_v17 = vxor.u32 %v314_v1, %v286_v60  ;;  %v287_v19 = vmul.u32 2221713035, %v259_v16  ;;  %510 = vst.msk [vmem:[#allocation7 + $0x30] sm:$0xff] %vm502_vm5, %v566_v14  ;;  %v262_v28 = vxor.u32 %v234_v11, %v206_v63  ;;  %v152_v31 = vshrl.u32 %v124_v43, 16 }
  0x40   :  { %v288_v26 = vmul.u32 2221713035, %v260_v8  ;;  %v261_v27 = vxor.u32 %v233_v10, %v205_v29  ;;  %v235_v33 = vshrl.u32 %v207_v20, 15  ;;  %v125_v35 = vxor.u32 %v685_v7, %v94_v23 }
  0x41   :  { %vm370_vm10 = vcmp.ge.u32.totalorder %v342_v17, 429496730  ;;  %v315_v32 = vshrl.u32 %v287_v19, 16  ;;  %v290_v39 = vmul.u32 2221713035, %v262_v28  ;;  %v180_v44 = vxor.u32 %v152_v31, %v124_v43  ;;  %v408_v43 = vld [vmem:[#allocation4 + $0x90] sm:$0xff] }
  0x42   :  { %v454_v36 = vsel %vm370_vm10, %v745_v4, 0.0  ;;  %v316_v37 = vshrl.u32 %v288_v26, 16  ;;  %v289_v38 = vmul.u32 2221713035, %v261_v27  ;;  %v263_v42 = vxor.u32 %v235_v33, %v207_v20 }
  0x43   :  { %569 = vtanh.f32 %v454_v36  ;;  %v343_v40 = vxor.u32 %v315_v32, %v287_v19  ;;  %v318_v46 = vshrl.u32 %v290_v39, 16  ;;  %v153_v47 = vshrl.u32 %v125_v35, 16 }
  0x44   :  { %v344_v21 = vxor.u32 %v316_v37, %v288_v26  ;;  %v317_v45 = vshrl.u32 %v289_v38, 16  ;;  %v291_v48 = vmul.u32 2221713035, %v263_v42  ;;  %v208_v49 = vmul.u32 2146121005, %v180_v44 }
  0x45   :  { %vm371_vm11 = vcmp.ge.u32.totalorder %v343_v40, 429496730  ;;  %v568_v50 = vpop.eup %567  ;;  %v346_v4 = vxor.u32 %v318_v46, %v290_v39  ;;  %v181_v56 = vxor.u32 %v153_v47, %v125_v35  ;;  %v67_v61 = vadd.s32 3844, %v683_v3  ;;  %v409_v39 = vld [vmem:[#allocation4 + $0x98] sm:$0x7f] }
  0x46   :  { %v455_v51 = vsel %vm371_vm11, %v749_v12, 0.0  ;;  %vm372_vm12 = vcmp.ge.u32.totalorder %v344_v21, 429496730  ;;  %v345_v52 = vxor.u32 %v317_v45, %v289_v38  ;;  %511 = vst.msk [vmem:[#allocation7 + $0x38] sm:$0x7f] %vm506_vm7, %v568_v50  ;;  %v319_v54 = vshrl.u32 %v291_v48, 16 }
  0x47   :  { %571 = vtanh.f32 %v455_v51  ;;  %v456_v53 = vsel %vm372_vm12, %v754_v25, 0.0  ;;  %v236_v55 = vshrl.u32 %v208_v49, 15  ;;  %vm374_vm14 = vcmp.ge.u32.totalorder %v346_v4, 429496730 }
  0x48   :  { %573 = vtanh.f32 %v456_v53  ;;  %vm373_vm13 = vcmp.ge.u32.totalorder %v345_v52, 429496730  ;;  %v458_v58 = vsel %vm374_vm14, %v765_v41, 0.0  ;;  %v347_v12 = vxor.u32 %v319_v54, %v291_v48  ;;  %v407_v41 = vld [vmem:[#allocation4 + $0x88] sm:$0xff] }
  0x49   :  { %v457_v57 = vsel %vm373_vm13, %v758_v30, 0.0  ;;  %v264_v59 = vxor.u32 %v236_v55, %v208_v49  ;;  %v209_v60 = vmul.u32 2146121005, %v181_v56  ;;  %v432_v29 = vmul.f32 1.1111112, %v404_v18 }
  0x4a   :  { %575 = vtanh.f32 %v457_v57  ;;  %vm375_vm15 = vcmp.ge.u32.totalorder %v347_v12, 429496730  ;;  %v95_v34 = vadd.s32 %v67_v61, %v681_v2  ;;  %v68_v30 = vadd.s32 3844, %v689_v9 }
  0x4b   :  { %577 = vtanh.f32 %v458_v58  ;;  %v292_v25 = vmul.u32 2221713035, %v264_v59  ;;  %v459_v63 = vsel %vm375_vm15, %v774_v24, 0.0  ;;  %v237_v0 = vshrl.u32 %v209_v60, 15  ;;  %v410_v59 = vld [vmem:[#allocation4 + $0xa0] sm:$0xff] }
  0x4c   :  { %579 = vtanh.f32 %v459_v63  ;;  %v433_v16 = vmul.f32 1.1111112, %v405_v22  ;;  %v69_v5 = vadd.s32 3844, %v692_v13  ;;  %v126_v8 = vxor.u32 %v685_v7, %v95_v34 }
  0x4d   :  { %v320_v1 = vshrl.u32 %v292_v25, 16  ;;  %v265_v6 = vxor.u32 %v237_v0, %v209_v60  ;;  %v796_v10 = vmul.f32 1.1111112, %v406_v62  ;;  %v96_v11 = vadd.s32 %v68_v30, %v681_v2 }
  0x4e   :  { %v799_v14 = vmul.f32 1.1111112, %v407_v41  ;;  %v97_v17 = vadd.s32 %v69_v5, %v681_v2  ;;  %v70_v19 = vadd.s32 3844, %v694_v15  ;;  %v154_v26 = vshrl.u32 %v126_v8, 16 }
  0x4f   :  { %v348_v24 = vxor.u32 %v320_v1, %v292_v25  ;;  %v293_v23 = vmul.u32 2221713035, %v265_v6  ;;  %v127_v27 = vxor.u32 %v685_v7, %v96_v11  ;;  %v71_v28 = vadd.s32 4805, %v683_v3 }
  0x50   :  { %v570_v20 = vpop.eup %569  ;;  %v128_v31 = vxor.u32 %v685_v7, %v97_v17  ;;  %v807_v32 = vmul.f32 1.1111112, %v408_v43  ;;  %v98_v33 = vadd.s32 %v70_v19, %v681_v2  ;;  %v182_v37 = vxor.u32 %v154_v26, %v126_v8 }
  0x51   :  { %512 = vst.msk [vmem:[#allocation7 + $0x40] sm:$0xff] %vm502_vm5, %v570_v20  ;;  %vm376_vm0 = vcmp.ge.u32.totalorder %v348_v24, 429496730  ;;  %v321_v36 = vshrl.u32 %v293_v23, 16  ;;  %v155_v38 = vshrl.u32 %v127_v27, 16  ;;  %v99_v44 = vadd.s32 %v71_v28, %v681_v2 }
  0x52   :  { %v460_v35 = vsel %vm376_vm0, %v432_v29, 0.0  ;;  %v156_v40 = vshrl.u32 %v128_v31, 16  ;;  %v129_v42 = vxor.u32 %v685_v7, %v98_v33  ;;  %v210_v46 = vmul.u32 2146121005, %v182_v37 }
  0x53   :  { %581 = vtanh.f32 %v460_v35  ;;  %v349_v45 = vxor.u32 %v321_v36, %v293_v23  ;;  %v183_v47 = vxor.u32 %v155_v38, %v127_v27  ;;  %v72_v48 = vadd.s32 4805, %v689_v9 }
  0x54   :  { %v572_v21 = vpop.eup %571  ;;  %v184_v50 = vxor.u32 %v156_v40, %v128_v31  ;;  %v157_v51 = vshrl.u32 %v129_v42, 16  ;;  %v814_v52 = vmul.f32 1.1111112, %v409_v39  ;;  %v130_v4 = vxor.u32 %v685_v7, %v99_v44 }
  0x55   :  { %v574_v49 = vpop.eup %573  ;;  %513 = vst.msk [vmem:[#allocation7 + $0x48] sm:$0xff] %vm502_vm5, %v572_v21  ;;  %vm377_vm1 = vcmp.ge.u32.totalorder %v349_v45, 429496730  ;;  %v238_v53 = vshrl.u32 %v210_v46, 15  ;;  %v211_v54 = vmul.u32 2146121005, %v183_v47  ;;  %v100_v55 = vadd.s32 %v72_v48, %v681_v2 }
  0x56   :  { %514 = vst.msk [vmem:[#allocation7 + $0x50] sm:$0xff] %vm502_vm5, %v574_v49  ;;  %v461_v56 = vsel %vm377_vm1, %v433_v16, 0.0  ;;  %v212_v57 = vmul.u32 2146121005, %v184_v50  ;;  %v185_v58 = vxor.u32 %v157_v51, %v129_v42  ;;  %v158_v12 = vshrl.u32 %v130_v4, 16 }
  0x57   :  { %v576_v18 = vpop.eup %575  ;;  %583 = vtanh.f32 %v461_v56  ;;  %v266_v22 = vxor.u32 %v238_v53, %v210_v46  ;;  %v239_v61 = vshrl.u32 %v211_v54, 15  ;;  %v131_v62 = vxor.u32 %v685_v7, %v100_v55 }
  0x58   :  { %v578_v60 = vpop.eup %577  ;;  %515 = vst.msk [vmem:[#allocation7 + $0x58] sm:$0x7f] %vm506_vm7, %v576_v18  ;;  %v240_v25 = vshrl.u32 %v212_v57, 15  ;;  %v213_v29 = vmul.u32 2146121005, %v185_v58  ;;  %v186_v63 = vxor.u32 %v158_v12, %v130_v4  ;;  %v73_v0 = vadd.s32 4805, %v692_v13 }
  0x59   :  { %516 = vst.msk [vmem:[#allocation7 + $0x60] sm:$0xff] %vm502_vm5, %v578_v60  ;;  %v580_v34 = vpop.eup %579  ;;  %v294_v30 = vmul.u32 2221713035, %v266_v22  ;;  %v267_v41 = vxor.u32 %v239_v61, %v211_v54  ;;  %v438_v1 = vmul.f32 1.1111112, %v410_v59  ;;  %v159_v16 = vshrl.u32 %v131_v62, 16 }
  0x5a   :  { %517 = vst.msk [vmem:[#allocation7 + $0x68] sm:$0xff] %vm502_vm5, %v580_v34  ;;  %v268_v5 = vxor.u32 %v240_v25, %v212_v57  ;;  %v241_v6 = vshrl.u32 %v213_v29, 15  ;;  %v214_v8 = vmul.u32 2146121005, %v186_v63  ;;  %v101_v11 = vadd.s32 %v73_v0, %v681_v2  ;;  %v411_v54 = vld [vmem:[#allocation4 + $0xa8] sm:$0xff] }
  0x5b   :  { %v322_v43 = vshrl.u32 %v294_v30, 16  ;;  %v295_v24 = vmul.u32 2221713035, %v267_v41  ;;  %v187_v17 = vxor.u32 %v159_v16, %v131_v62  ;;  %v74_v19 = vadd.s32 4805, %v694_v15 }
  0x5c   :  { %v296_v20 = vmul.u32 2221713035, %v268_v5  ;;  %v269_v23 = vxor.u32 %v241_v6, %v213_v29  ;;  %v242_v26 = vshrl.u32 %v214_v8, 15  ;;  %v132_v27 = vxor.u32 %v685_v7, %v101_v11  ;;  %v412_v29 = vld [vmem:[#allocation4 + $0xb0] sm:$0xff] }
  0x5d   :  { %v350_v28 = vxor.u32 %v322_v43, %v294_v30  ;;  %v323_v31 = vshrl.u32 %v295_v24, 16  ;;  %v215_v33 = vmul.u32 2146121005, %v187_v17  ;;  %v102_v35 = vadd.s32 %v74_v19, %v681_v2 }
  0x5e   :  { %v324_v36 = vshrl.u32 %v296_v20, 16  ;;  %v297_v37 = vmul.u32 2221713035, %v269_v23  ;;  %v270_v38 = vxor.u32 %v242_v26, %v214_v8  ;;  %v160_v39 = vshrl.u32 %v132_v27, 16  ;;  %v413_v23 = vld [vmem:[#allocation4 + $0xb8] sm:$0x7f] }
  0x5f   :  { %vm378_vm2 = vcmp.ge.u32.totalorder %v350_v28, 429496730  ;;  %v351_v42 = vxor.u32 %v323_v31, %v295_v24  ;;  %v243_v44 = vshrl.u32 %v215_v33, 15  ;;  %v133_v21 = vxor.u32 %v685_v7, %v102_v35 }
  0x60   :  { %v582_v40 = vpop.eup %581  ;;  %v462_v45 = vsel %vm378_vm2, %v796_v10, 0.0  ;;  %v352_v46 = vxor.u32 %v324_v36, %v296_v20  ;;  %v325_v47 = vshrl.u32 %v297_v37, 16  ;;  %v298_v48 = vmul.u32 2221713035, %v270_v38 }
  0x61   :  { %518 = vst.msk [vmem:[#allocation7 + $0x70] sm:$0xff] %vm502_vm5, %v582_v40  ;;  %585 = vtanh.f32 %v462_v45  ;;  %vm379_vm3 = vcmp.ge.u32.totalorder %v351_v42, 429496730  ;;  %v271_v49 = vxor.u32 %v243_v44, %v215_v33  ;;  %v188_v50 = vxor.u32 %v160_v39, %v132_v27 }
  0x62   :  { %v463_v51 = vsel %vm379_vm3, %v799_v14, 0.0  ;;  %vm380_vm4 = vcmp.ge.u32.totalorder %v352_v46, 429496730  ;;  %v353_v4 = vxor.u32 %v325_v47, %v297_v37  ;;  %v326_v53 = vshrl.u32 %v298_v48, 16 }
  0x63   :  { %587 = vtanh.f32 %v463_v51  ;;  %v464_v55 = vsel %vm380_vm4, %v807_v32, 0.0  ;;  %v299_v18 = vmul.u32 2221713035, %v271_v49  ;;  %v216_v56 = vmul.u32 2146121005, %v188_v50 }
  0x64   :  { %v584_v57 = vpop.eup %583  ;;  %589 = vtanh.f32 %v464_v55  ;;  %vm381_vm6 = vcmp.ge.u32.totalorder %v353_v4, 429496730  ;;  %v354_v10 = vxor.u32 %v326_v53, %v298_v48  ;;  %v161_v58 = vshrl.u32 %v133_v21, 16  ;;  %v414_v53 = vld [vmem:[#allocation4 + $0xc0] sm:$0xff] }
  0x65   :  { %519 = vst.msk [vmem:[#allocation7 + $0x78] sm:$0x7f] %vm506_vm7, %v584_v57  ;;  %v465_v12 = vsel %vm381_vm6, %v814_v52, 0.0  ;;  %v327_v59 = vshrl.u32 %v299_v18, 16  ;;  %v439_v14 = vmul.f32 1.1111112, %v411_v54 }
  0x66   :  { %v244_v60 = vshrl.u32 %v216_v56, 15  ;;  %591 = vtanh.f32 %v465_v12  ;;  %vm382_vm8 = vcmp.ge.u32.totalorder %v354_v10, 429496730  ;;  %v189_v22 = vxor.u32 %v161_v58, %v133_v21  ;;  %v415_v58 = vld [vmem:[#allocation4 + $0xc8] sm:$0xff] }
  0x67   :  { %v75_v61 = vadd.s32 5766, %v683_v3  ;;  %v466_v32 = vsel %vm382_vm8, %v438_v1, 0.0  ;;  %v355_v62 = vxor.u32 %v327_v59, %v299_v18  ;;  %v76_v34 = vadd.s32 5766, %v689_v9 }
  0x68   :  { %v272_v25 = vxor.u32 %v244_v60, %v216_v56  ;;  %593 = vtanh.f32 %v466_v32  ;;  %v217_v63 = vmul.u32 2146121005, %v189_v22  ;;  %v440_v1 = vmul.f32 1.1111112, %v412_v29 }
  0x69   :  { %v103_v0 = vadd.s32 %v75_v61, %v681_v2  ;;  %vm383_vm9 = vcmp.ge.u32.totalorder %v355_v62, 429496730  ;;  %v104_v5 = vadd.s32 %v76_v34, %v681_v2  ;;  %v77_v6 = vadd.s32 5766, %v692_v13  ;;  %v416_v62 = vld [vmem:[#allocation4 + $0xd0] sm:$0xff] }
  0x6a   :  { %v300_v52 = vmul.u32 2221713035, %v272_v25  ;;  %v467_v30 = vsel %vm383_vm9, %v439_v14, 0.0  ;;  %v245_v41 = vshrl.u32 %v217_v63, 15  ;;  %v78_v24 = vadd.s32 5766, %v694_v15 }
  0x6b   :  { %v134_v16 = vxor.u32 %v685_v7, %v103_v0  ;;  %595 = vtanh.f32 %v467_v30  ;;  %v135_v43 = vxor.u32 %v685_v7, %v104_v5  ;;  %v105_v17 = vadd.s32 %v77_v6, %v681_v2 }
  0x6c   :  { %v328_v3 = vshrl.u32 %v300_v52, 16  ;;  %v273_v8 = vxor.u32 %v245_v41, %v217_v63  ;;  %v106_v28 = vadd.s32 %v78_v24, %v681_v2  ;;  %v441_v38 = vmul.f32 1.1111112, %v413_v23 }
  0x6d   :  { %v162_v11 = vshrl.u32 %v134_v16, 16  ;;  %v163_v27 = vshrl.u32 %v135_v43, 16  ;;  %v136_v13 = vxor.u32 %v685_v7, %v105_v17  ;;  %v442_v12 = vmul.f32 1.1111112, %v414_v53 }
  0x6e   :  { %v356_v9 = vxor.u32 %v328_v3, %v300_v52  ;;  %v586_v19 = vpop.eup %585  ;;  %v301_v20 = vmul.u32 2221713035, %v273_v8  ;;  %v137_v40 = vxor.u32 %v685_v7, %v106_v28  ;;  %v443_v61 = vmul.f32 1.1111112, %v415_v58  ;;  %v417_v52 = vld [vmem:[#allocation4 + $0xd8] sm:$0x7f] }
  0x6f   :  { %v190_v26 = vxor.u32 %v162_v11, %v134_v16  ;;  %520 = vst.msk [vmem:[#allocation7 + $0x80] sm:$0xff] %vm502_vm5, %v586_v19  ;;  %v191_v15 = vxor.u32 %v163_v27, %v135_v43  ;;  %v164_v39 = vshrl.u32 %v136_v13, 16  ;;  %v444_v41 = vmul.f32 1.1111112, %v416_v62 }
  0x70   :  { %vm384_vm10 = vcmp.ge.u32.totalorder %v356_v9, 429496730  ;;  %v588_v31 = vpop.eup %587  ;;  %v329_v35 = vshrl.u32 %v301_v20, 16  ;;  %v165_v46 = vshrl.u32 %v137_v40, 16 }
  0x71   :  { %v468_v33 = vsel %vm384_vm10, %v440_v1, 0.0  ;;  %v218_v36 = vmul.u32 2146121005, %v190_v26  ;;  %v590_v37 = vpop.eup %589  ;;  %521 = vst.msk [vmem:[#allocation7 + $0x88] sm:$0xff] %vm502_vm5, %v588_v31  ;;  %v219_v44 = vmul.u32 2146121005, %v191_v15  ;;  %v192_v45 = vxor.u32 %v164_v39, %v136_v13 }
  0x72   :  { %597 = vtanh.f32 %v468_v33  ;;  %522 = vst.msk [vmem:[#allocation7 + $0x90] sm:$0xff] %vm502_vm5, %v590_v37  ;;  %v357_v2 = vxor.u32 %v329_v35, %v301_v20  ;;  %v193_v4 = vxor.u32 %v165_v46, %v137_v40  ;;  %v445_v1 = vmul.f32 1.1111112, %v417_v52 }
  0x73   :  { %v246_v42 = vshrl.u32 %v218_v36, 15  ;;  %v592_v21 = vpop.eup %591  ;;  %v247_v48 = vshrl.u32 %v219_v44, 15  ;;  %v220_v51 = vmul.u32 2146121005, %v192_v45 }
  0x74   :  { %523 = vst.msk [vmem:[#allocation7 + $0x98] sm:$0x7f] %vm506_vm7, %v592_v21  ;;  %vm385_vm11 = vcmp.ge.u32.totalorder %v357_v2, 429496730  ;;  %v221_v18 = vmul.u32 2146121005, %v193_v4 }
  0x75   :  { %v274_v47 = vxor.u32 %v246_v42, %v218_v36  ;;  %v594_v49 = vpop.eup %593  ;;  %v469_v50 = vsel %vm385_vm11, %v441_v38, 0.0  ;;  %v275_v54 = vxor.u32 %v247_v48, %v219_v44  ;;  %v248_v55 = vshrl.u32 %v220_v51, 15 }
  0x76   :  { %524 = vst.msk [vmem:[#allocation7 + $0xa0] sm:$0xff] %vm502_vm5, %v594_v49  ;;  %599 = vtanh.f32 %v469_v50  ;;  %v249_v14 = vshrl.u32 %v221_v18, 15 }
  0x77   :  { %v302_v7 = vmul.u32 2221713035, %v274_v47  ;;  %v303_v10 = vmul.u32 2221713035, %v275_v54  ;;  %v276_v59 = vxor.u32 %v248_v55, %v220_v51 }
  0x78   :  { %v596_v56 = vpop.eup %595  ;;  %v277_v25 = vxor.u32 %v249_v14, %v221_v18 }
  0x79   :  { %v330_v57 = vshrl.u32 %v302_v7, 16  ;;  %525 = vst.msk [vmem:[#allocation7 + $0xa8] sm:$0xff] %vm502_vm5, %v596_v56  ;;  %v331_v22 = vshrl.u32 %v303_v10, 16  ;;  %v304_v32 = vmul.u32 2221713035, %v276_v59 }
  0x7a   :  { %v305_v34 = vmul.u32 2221713035, %v277_v25 }
  0x7b   :  { %v358_v60 = vxor.u32 %v330_v57, %v302_v7  ;;  %v359_v29 = vxor.u32 %v331_v22, %v303_v10  ;;  %v332_v0 = vshrl.u32 %v304_v32, 16 }
  0x7c   :  { %v333_v3 = vshrl.u32 %v305_v34, 16 }
  0x7d   :  { %vm386_vm12 = vcmp.ge.u32.totalorder %v358_v60, 429496730  ;;  %vm387_vm13 = vcmp.ge.u32.totalorder %v359_v29, 429496730  ;;  %v360_v5 = vxor.u32 %v332_v0, %v304_v32 }
  0x7e   :  { %v470_v63 = vsel %vm386_vm12, %v442_v12, 0.0  ;;  %v471_v16 = vsel %vm387_vm13, %v443_v61, 0.0  ;;  %v361_v6 = vxor.u32 %v333_v3, %v305_v34 }
  0x7f   :  { %v598_v30 = vpop.eup %597  ;;  %601 = vtanh.f32 %v470_v63  ;;  %vm388_vm14 = vcmp.ge.u32.totalorder %v360_v5, 429496730 }
  0x80   :  { %526 = vst.msk [vmem:[#allocation7 + $0xb0] sm:$0xff] %vm502_vm5, %v598_v30  ;;  %603 = vtanh.f32 %v471_v16  ;;  %v472_v8 = vsel %vm388_vm14, %v444_v41, 0.0  ;;  %vm389_vm15 = vcmp.ge.u32.totalorder %v361_v6, 429496730 }
  0x81   :  { %605 = vtanh.f32 %v472_v8  ;;  %v473_v43 = vsel %vm389_vm15, %v445_v1, 0.0 }
  0x82   :  { %607 = vtanh.f32 %v473_v43 }
  0x83   :  { %v600_v11 = vpop.eup %599 }
  0x84   :  { %527 = vst.msk [vmem:[#allocation7 + $0xb8] sm:$0x7f] %vm506_vm7, %v600_v11 }
  0x8c   :  { %v602_v24 = vpop.eup %601 }
  0x8d   :  { %528 = vst.msk [vmem:[#allocation7 + $0xc0] sm:$0xff] %vm502_vm5, %v602_v24  ;;  %v604_v9 = vpop.eup %603 }
  0x8e   :  { %529 = vst.msk [vmem:[#allocation7 + $0xc8] sm:$0xff] %vm502_vm5, %v604_v9  ;;  %v606_v17 = vpop.eup %605 }
  0x8f   :  { %530 = vst.msk [vmem:[#allocation7 + $0xd0] sm:$0xff] %vm502_vm5, %v606_v17  ;;  %v608_v19 = vpop.eup %607 }
  0x90   :  { %531 = vst.msk [vmem:[#allocation7 + $0xd8] sm:$0x7f] %vm506_vm7, %v608_v19 }
  0x91   :  { %640 = shalt.err (!%p637_p9)
}
  0x92   :  { %543 = dma.vmem_to_hbm [thread:$0]  %s538_s1, 3584, %s867_s2, [#allocation6], %s654_s12, %s654_s12, %s655_s13  }
  0x93   :  { %651 = dma.done.wait [#allocation6], 3584  }
  0x94   :  { %652 = vsyncadd [#allocation6], 4294963712 }
  0x95   :  { %547 = vsyncpa [#allocation5], 1 }
  0x96   :  { %548 = vsyncpa [#allocation6], 1 }

</bundles_post_ra>
